<compile_context>
chip_gen: v5e
topology: v5e:2x2
jax: 0.10.0
libtpu: 0.0.40
codegen_flags: <defaults>
</compile_context>

<pallas_src>
import math
import functools

import jax
import jax.numpy as jnp
from jax.experimental import pallas as pl
from jax.experimental.pallas import tpu as pltpu


# ----------------------------------------------------------------------------
# Pallas kernel (one batch tile): two half-matmuls -> ReLU -> VPU reduce ->
# sigmoid -> optional rating rescale.  Everything is batch-on-lanes.
# ----------------------------------------------------------------------------
def _mlp_kernel(u_ref, m_ref, w1u_ref, w1m_ref, b1_ref, w2_ref, b2_ref, out_ref,
                *, min_rating, max_rating, use_minmax):
    # u_ref, m_ref : [F, TB]   features, batch on the lane axis
    # w1u_ref      : [H, F]    user half of W1, transposed
    # w1m_ref      : [H, F]    movie half of W1, transposed
    # b1_ref       : [H, 1]
    # w2_ref       : [H, 1]
    # b2_ref       : [1, 1]    SMEM scalar
    # out_ref      : [1, TB]   lane-dense output row

    # Hidden layer: (x @ W1 + b1)^T == W1u^T @ u^T + W1m^T @ m^T + b1^T
    h = (jnp.dot(w1u_ref[...], u_ref[...], preferred_element_type=jnp.float32)
         + jnp.dot(w1m_ref[...], m_ref[...], preferred_element_type=jnp.float32)
         + b1_ref[...])                       # [H, TB] f32
    h = jnp.maximum(h, 0.0)                   # ReLU

    # Output layer as VPU multiply + cross-sublane reduce instead of an
    # N=1 GEMV on the MXU:  (h @ w2)^T = sum_H(h^T * w2)
    logits = jnp.sum(h * w2_ref[...], axis=0, keepdims=True) + b2_ref[0, 0]  # [1, TB]

    # Sigmoid.  (pl.reciprocal(..., approx=True) would route the divide to the
    # EUP vrcp slot; exact division is kept here to preserve the 1e-5 check —
    # the kernel is memory-bound so the divide is hidden anyway.)
    s = 1.0 / (1.0 + jnp.exp(-logits))

    if use_minmax:
        s = s * (max_rating - min_rating + 1.0) + (min_rating - 0.5)

    out_ref[...] = s.astype(out_ref.dtype)


# ----------------------------------------------------------------------------
# Wrapper: gather embeddings, lay features out batch-on-lanes, tile the batch.
# ----------------------------------------------------------------------------
def embedding_net_forward(users, movies, params, minmax=None, *,
                          block_b=1024, compute_dtype=jnp.float32):
    """Forward pass of EmbeddingNet.

    users, movies: int32 [B]
    params: dict with 'u_emb' [n_users, F], 'm_emb' [n_movies, F],
            'w1' [2F, H], 'b1' [1, H], 'w2' [H, 1], 'b2' [1, 1]
    Returns: float32 [B, 1]
    """
    u_emb, m_emb = params["u_emb"], params["m_emb"]
    w1, b1, w2, b2 = params["w1"], params["b1"], params["w2"], params["b2"]

    B = users.shape[0]
    F = u_emb.shape[1]
    H = w1.shape[1]

    # Batch tiling: whole batch as a single tile if it fits, otherwise tiles of
    # TB rows with TB a multiple of 128 (lane-dense blocks + pipelining).
    if B <= block_b:
        tb = B
        b_pad = B
    else:
        tb = max(128, (block_b // 128) * 128)
        b_pad = pl.cdiv(B, tb) * tb
    nb = b_pad // tb

    if b_pad != B:
        pad = b_pad - B
        users = jnp.pad(users, (0, pad))    # index 0 is valid; sliced off below
        movies = jnp.pad(movies, (0, pad))

    # Embedding gather (glue, outside the kernel) -> batch-on-lanes [F, B_pad].
    u_t = jnp.take(u_emb, users, axis=0).T.astype(compute_dtype)
    m_t = jnp.take(m_emb, movies, axis=0).T.astype(compute_dtype)

    # Split W1 so no [B, 2F] concat is ever materialized; store transposed.
    w1u_t = w1[:F, :].T.astype(compute_dtype)   # [H, F]
    w1m_t = w1[F:, :].T.astype(compute_dtype)   # [H, F]
    b1_c = b1.reshape(H, 1).astype(jnp.float32)  # [H, 1]
    w2_c = w2.reshape(H, 1).astype(jnp.float32)  # [H, 1]
    b2_c = b2.reshape(1, 1).astype(jnp.float32)  # [1, 1] -> SMEM scalar

    if minmax is not None:
        min_rating, max_rating = float(minmax[0]), float(minmax[1])
        use_minmax = True
    else:
        min_rating = max_rating = 0.0
        use_minmax = False

    kernel = functools.partial(
        _mlp_kernel,
        min_rating=min_rating,
        max_rating=max_rating,
        use_minmax=use_minmax,
    )

    out_row = pl.pallas_call(
        kernel,
        out_shape=jax.ShapeDtypeStruct((1, b_pad), jnp.float32),
        grid_spec=pltpu.PrefetchScalarGridSpec(
            num_scalar_prefetch=0,
            grid=(nb,),
            in_specs=[
                pl.BlockSpec((F, tb), lambda i: (0, i)),    # user features
                pl.BlockSpec((F, tb), lambda i: (0, i)),    # movie features
                pl.BlockSpec((H, F), lambda i: (0, 0)),     # W1 user half (resident)
                pl.BlockSpec((H, F), lambda i: (0, 0)),     # W1 movie half (resident)
                pl.BlockSpec((H, 1), lambda i: (0, 0)),     # b1 (resident)
                pl.BlockSpec((H, 1), lambda i: (0, 0)),     # w2 (resident)
                pl.BlockSpec(memory_space=pltpu.MemorySpace.SMEM),  # b2 scalar
            ],
            out_specs=pl.BlockSpec((1, tb), lambda i: (0, i)),
        ),
        compiler_params=pltpu.CompilerParams(
            dimension_semantics=("parallel",)),
    )(u_t, m_t, w1u_t, w1m_t, b1_c, w2_c, b2_c)

    # (1, B_pad) lane-dense row -> [B, 1] column (layout plumbing, no compute).
    return out_row[0, :B].reshape(B, 1)


# ----------------------------------------------------------------------------
# Deterministic parameter initialization (mirrors EmbeddingNet._init)
# ----------------------------------------------------------------------------
def init_params(key, n_users, n_movies, n_factors, hidden):
    k_u, k_m, k_w1, k_w2 = jax.random.split(key, 4)

    # Embeddings ~ U(-0.05, 0.05)
    u_emb = jax.random.uniform(k_u, (n_users, n_factors),
                               minval=-0.05, maxval=0.05, dtype=jnp.float32)
    m_emb = jax.random.uniform(k_m, (n_movies, n_factors),
                               minval=-0.05, maxval=0.05, dtype=jnp.float32)

    # Xavier-uniform linear weights (stored [in, out]), biases = 0.01
    def xavier(k, fan_in, fan_out):
        bound = math.sqrt(6.0 / (fan_in + fan_out))
        return jax.random.uniform(k, (fan_in, fan_out),
                                  minval=-bound, maxval=bound,
                                  dtype=jnp.float32)

    w1 = xavier(k_w1, 2 * n_factors, hidden)
    b1 = jnp.full((1, hidden), 0.01, dtype=jnp.float32)
    w2 = xavier(k_w2, hidden, 1)
    b2 = jnp.full((1, 1), 0.01, dtype=jnp.float32)

    return dict(u_emb=u_emb, m_emb=m_emb, w1=w1, b1=b1, w2=w2, b2=b2)


# ----------------------------------------------------------------------------
# Pure-JAX reference (sanity check)
# ----------------------------------------------------------------------------
def reference_forward(users, movies, params, minmax=None):
    u = jnp.take(params["u_emb"], users, axis=0)
    m = jnp.take(params["m_emb"], movies, axis=0)
    x = jnp.concatenate([u, m], axis=1)
    h = jnp.maximum(x @ params["w1"] + params["b1"], 0.0)
    o = h @ params["w2"] + params["b2"]
    s = jax.nn.sigmoid(o)
    if minmax is not None:
        mn, mx = minmax
        s = s * (mx - mn + 1.0) + mn - 0.5
    return s


if __name__ == "__main__":
    key = jax.random.PRNGKey(0)
    k_params, k_users, k_movies, k_users2, k_movies2 = jax.random.split(key, 5)

    # Small shapes consistent with the module (hidden is a single int -> [H]).
    n_users, n_movies = 40, 60
    n_factors = 16        # embedding width
    hidden = 32           # single hidden layer
    batch = 8

    params = init_params(k_params, n_users, n_movies, n_factors, hidden)
    minmax = (1.0, 5.0)   # e.g. MovieLens rating range

    # --- check 1: small batch, single tile ---
    users = jax.random.randint(k_users, (batch,), 0, n_users, dtype=jnp.int32)
    movies = jax.random.randint(k_movies, (batch,), 0, n_movies, dtype=jnp.int32)

    out = embedding_net_forward(users, movies, params, minmax=minmax)
    out = jax.block_until_ready(out)
    ref = reference_forward(users, movies, params, minmax=minmax)
    assert out.shape == (batch, 1), out.shape
    assert jnp.allclose(out, ref, atol=1e-5, rtol=1e-5), (out, ref)

    # --- check 2: multi-tile path (grid > 1, padding + lane-dense 128 tiles) ---
    batch2 = 300
    users2 = jax.random.randint(k_users2, (batch2,), 0, n_users, dtype=jnp.int32)
    movies2 = jax.random.randint(k_movies2, (batch2,), 0, n_movies, dtype=jnp.int32)

    out2 = embedding_net_forward(users2, movies2, params, minmax=minmax,
                                 block_b=128)
    out2 = jax.block_until_ready(out2)
    ref2 = reference_forward(users2, movies2, params, minmax=minmax)
    assert out2.shape == (batch2, 1), out2.shape
    assert jnp.allclose(out2, ref2, atol=1e-5, rtol=1e-5), (out2, ref2)

    print("KERNEL_OK")
</pallas_src>

<mosaic_0001>
module attributes {stable_mosaic.version = 11 : i64} {
  func.func @_mlp_kernel(%arg0: i32, %arg1: memref<16x8xf32, #tpu.memory_space<vmem>>, %arg2: memref<16x8xf32, #tpu.memory_space<vmem>>, %arg3: memref<32x16xf32, #tpu.memory_space<vmem>>, %arg4: memref<32x16xf32, #tpu.memory_space<vmem>>, %arg5: memref<32x1xf32, #tpu.memory_space<vmem>>, %arg6: memref<32x1xf32, #tpu.memory_space<vmem>>, %arg7: memref<1x1xf32, #tpu.memory_space<smem>>, %arg8: memref<1x8xf32, #tpu.memory_space<vmem>>) attributes {dimension_semantics = [#tpu.dimension_semantics<parallel>], iteration_bounds = array<i64: 1>, scalar_prefetch = 0 : i64, scratch_operands = 0 : i64, tpu.core_type = #tpu.core_type<tc>, window_params = [{transform_indices = @transform_0, window_bounds = array<i64: 16, 8>}, {transform_indices = @transform_1, window_bounds = array<i64: 16, 8>}, {pipeline_mode = #tpu.pipeline_mode<synchronous>, transform_indices = @transform_2, window_bounds = array<i64: 32, 16>}, {pipeline_mode = #tpu.pipeline_mode<synchronous>, transform_indices = @transform_3, window_bounds = array<i64: 32, 16>}, {pipeline_mode = #tpu.pipeline_mode<synchronous>, transform_indices = @transform_4, window_bounds = array<i64: 32, 1>}, {pipeline_mode = #tpu.pipeline_mode<synchronous>, transform_indices = @transform_5, window_bounds = array<i64: 32, 1>}, {transform_indices = @transform_6, window_bounds = array<i64: 1, 1>}, {transform_indices = @transform_7, window_bounds = array<i64: 1, 8>}]} {
    %c0 = arith.constant 0 : index
    %c0_0 = arith.constant 0 : index
    %0 = vector.load %arg3[%c0, %c0_0] : memref<32x16xf32, #tpu.memory_space<vmem>>, vector<32x16xf32>
    %c0_1 = arith.constant 0 : index
    %c0_2 = arith.constant 0 : index
    %1 = vector.load %arg1[%c0_1, %c0_2] : memref<16x8xf32, #tpu.memory_space<vmem>>, vector<16x8xf32>
    %cst = arith.constant dense<0.000000e+00> : vector<32x8xf32>
    %2 = tpu.matmul %0, %1, %cst {dimension_numbers = #tpu.dot_dimension_numbers<[1], [0], [0], [1], [0, 0, 1, 1], [], []>} : vector<32x16xf32>, vector<16x8xf32>, vector<32x8xf32> -> vector<32x8xf32>
    %c0_3 = arith.constant 0 : index
    %c0_4 = arith.constant 0 : index
    %3 = vector.load %arg4[%c0_3, %c0_4] : memref<32x16xf32, #tpu.memory_space<vmem>>, vector<32x16xf32>
    %c0_5 = arith.constant 0 : index
    %c0_6 = arith.constant 0 : index
    %4 = vector.load %arg2[%c0_5, %c0_6] : memref<16x8xf32, #tpu.memory_space<vmem>>, vector<16x8xf32>
    %cst_7 = arith.constant dense<0.000000e+00> : vector<32x8xf32>
    %5 = tpu.matmul %3, %4, %cst_7 {dimension_numbers = #tpu.dot_dimension_numbers<[1], [0], [0], [1], [0, 0, 1, 1], [], []>} : vector<32x16xf32>, vector<16x8xf32>, vector<32x8xf32> -> vector<32x8xf32>
    %6 = arith.addf %2, %5 : vector<32x8xf32>
    %c0_8 = arith.constant 0 : index
    %c0_9 = arith.constant 0 : index
    %7 = vector.load %arg5[%c0_8, %c0_9] : memref<32x1xf32, #tpu.memory_space<vmem>>, vector<32x1xf32>
    %8 = vector.broadcast %7 : vector<32x1xf32> to vector<32x8xf32>
    %9 = arith.addf %6, %8 : vector<32x8xf32>
    %cst_10 = arith.constant 0.000000e+00 : f32
    %10 = vector.broadcast %cst_10 : f32 to vector<32x8xf32>
    %11 = arith.maximumf %9, %10 : vector<32x8xf32>
    %c0_11 = arith.constant 0 : index
    %c0_12 = arith.constant 0 : index
    %12 = vector.load %arg6[%c0_11, %c0_12] : memref<32x1xf32, #tpu.memory_space<vmem>>, vector<32x1xf32>
    %13 = vector.broadcast %12 : vector<32x1xf32> to vector<32x8xf32>
    %14 = arith.mulf %11, %13 : vector<32x8xf32>
    %cst_13 = arith.constant dense<0.000000e+00> : vector<8xf32>
    %15 = vector.multi_reduction <add>, %14, %cst_13 [0] : vector<32x8xf32> to vector<8xf32>
    %16 = vector.shape_cast %15 : vector<8xf32> to vector<1x8xf32>
    %c0_14 = arith.constant 0 : index
    %c0_15 = arith.constant 0 : index
    %17 = memref.load %arg7[%c0_14, %c0_15] : memref<1x1xf32, #tpu.memory_space<smem>>
    %18 = vector.broadcast %17 : f32 to vector<1x8xf32>
    %19 = arith.addf %16, %18 : vector<1x8xf32>
    %cst_16 = arith.constant 0.000000e+00 : f32
    %20 = vector.broadcast %cst_16 : f32 to vector<1x8xf32>
    %21 = arith.subf %20, %19 : vector<1x8xf32>
    %22 = math.exp %21 : vector<1x8xf32>
    %cst_17 = arith.constant 1.000000e+00 : f32
    %23 = vector.broadcast %cst_17 : f32 to vector<1x8xf32>
    %24 = arith.addf %23, %22 : vector<1x8xf32>
    %cst_18 = arith.constant 1.000000e+00 : f32
    %25 = vector.broadcast %cst_18 : f32 to vector<1x8xf32>
    %26 = arith.divf %25, %24 : vector<1x8xf32>
    %cst_19 = arith.constant 5.000000e+00 : f32
    %27 = vector.broadcast %cst_19 : f32 to vector<1x8xf32>
    %28 = arith.mulf %26, %27 : vector<1x8xf32>
    %cst_20 = arith.constant 5.000000e-01 : f32
    %29 = vector.broadcast %cst_20 : f32 to vector<1x8xf32>
    %30 = arith.addf %28, %29 : vector<1x8xf32>
    %c0_21 = arith.constant 0 : index
    %c0_22 = arith.constant 0 : index
    %31 = vector.load %arg8[%c0_21, %c0_22] : memref<1x8xf32, #tpu.memory_space<vmem>>, vector<1x8xf32>
    tpu.vector_store %arg8[%c0_21, %c0_22], %30 {strides = array<i32>} : memref<1x8xf32, #tpu.memory_space<vmem>>, vector<1x8xf32>,
    return
  }
  func.func @transform_0(%arg0: i32) -> (i32, i32) {
    %c0_i32 = arith.constant 0 : i32
    %c0_i32_0 = arith.constant 0 : i32
    return %c0_i32, %arg0 : i32, i32
  }
  func.func @transform_1(%arg0: i32) -> (i32, i32) {
    %c0_i32 = arith.constant 0 : i32
    %c0_i32_0 = arith.constant 0 : i32
    return %c0_i32, %arg0 : i32, i32
  }
  func.func @transform_2(%arg0: i32) -> (i32, i32) {
    %c0_i32 = arith.constant 0 : i32
    %c0_i32_0 = arith.constant 0 : i32
    %c0_i32_1 = arith.constant 0 : i32
    return %c0_i32, %c0_i32_0 : i32, i32
  }
  func.func @transform_3(%arg0: i32) -> (i32, i32) {
    %c0_i32 = arith.constant 0 : i32
    %c0_i32_0 = arith.constant 0 : i32
    %c0_i32_1 = arith.constant 0 : i32
    return %c0_i32, %c0_i32_0 : i32, i32
  }
  func.func @transform_4(%arg0: i32) -> (i32, i32) {
    %c0_i32 = arith.constant 0 : i32
    %c0_i32_0 = arith.constant 0 : i32
    %c0_i32_1 = arith.constant 0 : i32
    return %c0_i32, %c0_i32_0 : i32, i32
  }
  func.func @transform_5(%arg0: i32) -> (i32, i32) {
    %c0_i32 = arith.constant 0 : i32
    %c0_i32_0 = arith.constant 0 : i32
    %c0_i32_1 = arith.constant 0 : i32
    return %c0_i32, %c0_i32_0 : i32, i32
  }
  func.func @transform_6(%arg0: i32) -> (i32, i32) {
    %c0_i32 = arith.constant 0 : i32
    %c0_i32_0 = arith.constant 0 : i32
    %c0_i32_1 = arith.constant 0 : i32
    return %c0_i32, %c0_i32_0 : i32, i32
  }
  func.func @transform_7(%arg0: i32) -> (i32, i32) {
    %c0_i32 = arith.constant 0 : i32
    %c0_i32_0 = arith.constant 0 : i32
    return %c0_i32, %arg0 : i32, i32
  }
}

</mosaic_0001>

<bundles_post_ra>
// kernel: tpu_custom_call.1
= control target key start
LH: loop header
LB: loop body
LE: loop exit
PB: predicated region body
PF: predicated region fallthrough
CT: control target
= control target key end

     0   :  { %v286_v2 = vmov 0   ;;  %vm40_vm0 = vcmask 130048   ;;  %s406_s0 = inlined_call_operand.vmem [shape: f32[16,8], index: 0, kind: input, shape index: {}]   ;;  %s407_s1 = inlined_call_operand.vmem [shape: f32[16,8], index: 1, kind: input, shape index: {}]   ;;  %s408_s2 = inlined_call_operand.vmem [shape: f32[32,16], index: 2, kind: input, shape index: {}]   ;;  %s409_s3 = inlined_call_operand.vmem [shape: f32[32,16], index: 3, kind: input, shape index: {}]   ;;  %s410_s4 = inlined_call_operand.vmem [shape: f32[32,1], index: 4, kind: input, shape index: {}]   ;;  %s411_s5 = inlined_call_operand.vmem [shape: f32[32,1], index: 5, kind: input, shape index: {}]   ;;  %s412_s6 = inlined_call_operand.<no memory space> [shape: f32[1,1], index: 6, kind: input, shape index: {}]   ;;  %s413_s7 = inlined_call_operand.hbm [shape: f32[1,8], index: 7, kind: output, shape index: {}]  }
   0x1   :  { %v39_v0 = vld [vmem:[%s407_s1 + $0x8] sm:$0xff]  ;;  %253 = vset.pattern.permute.xlu0 %v286_v2  ;;  %v123_v3 = vld [vmem:[%s410_s4] sm:$0xff]  ;;  %v125_v4 = vld [vmem:[%s410_s4 + $0x10] sm:$0xff]  ;;  %254 = vset.pattern.permute.xlu1 %v286_v2 }
   0x2   :  { %v33_v1 = vld [vmem:[%s406_s0 + $0x8] sm:$0xff]  ;;  %67 = vmatpush.msra.mxu0 %v39_v0  ;;  %247 = vmatpush.msra.mxu2 %v39_v0  ;;  %v38_v5 = vld [vmem:[%s407_s1] sm:$0xff]  ;;  %v36_v8 = vld [vmem:[%s409_s3 + $0x10] sm:$0xff] }
   0x3   :  { %108 = vmatpush.msra.mxu1 %v33_v1  ;;  %249 = vmatpush.msra.mxu3 %v33_v1  ;;  %v32_v6 = vld [vmem:[%s406_s0] sm:$0xff]  ;;  %v30_v10 = vld [vmem:[%s408_s2 + $0x10] sm:$0xff] }
   0x4   :  { %129 = vperm.xlu0 %253, %v123_v3   ;;  %139 = vperm.xlu1 %254, %v125_v4   ;;  %v34_v7 = vld [vmem:[%s409_s3] sm:$0xff] }
   0x5   :  { %68 = vmatpush.msra.mxu0 %v38_v5  ;;  %248 = vmatpush.msra.mxu2 %v38_v5  ;;  %v28_v9 = vld [vmem:[%s408_s2] sm:$0xff] }
   0x6   :  { %109 = vmatpush.msra.mxu1 %v32_v6  ;;  %250 = vmatpush.msra.mxu3 %v32_v6 }
   0x7   :  { %13 = vsyncpa [#allocation4], 0  ;;  %239 = vmatmul.msk.f32.vlgmr.msra.gmra.mxu0 %vm40_vm0, %v34_v7  ;;  %241 = vmatmul.msk.f32.vlgmr.msra.gmra.mxu2 %vm40_vm0, %v36_v8  ;;  %v155_v11 = vld [vmem:[%s411_s5] sm:$0xff]  ;;  %v124_v12 = vld [vmem:[%s410_s4 + $0x8] sm:$0xff]  ;;  %vm183_vm1 = vcmask 64512   ;;  %v198_v1 = vstv %s412_s6  ;;  %s287_s6 = smov [#allocation3]  }
   0x8   :  { %243 = vmatmul.msk.f32.vlgmr.msra.gmra.mxu1 %vm40_vm0, %v28_v9  ;;  %245 = vmatmul.msk.f32.vlgmr.msra.gmra.mxu3 %vm40_vm0, %v30_v10  ;;  %v126_v13 = vld [vmem:[%s410_s4 + $0x18] sm:$0xff]  ;;  %v35_v14 = vld [vmem:[%s409_s3 + $0x8] sm:$0xff]  ;;  %v157_v19 = vld [vmem:[%s411_s5 + $0x10] sm:$0xff]  ;;  %s228_s14 = sshll.u32 %s287_s6, 4  ;;  %s230_s1 = sshll.u32 %s413_s7, 4  ;;  %vm221_vm6 = vcmask 57344   ;;  %s229_s14 = int_to_ptr.vmem [resolvable:$true] %s228_s14  ;;  %s231_s1 = int_to_ptr.hbm [resolvable:$true] %s230_s1 }
   0x9   :  { %255 = vset.pattern.permute.xlu2 %v286_v2  ;;  %v37_v15 = vld [vmem:[%s409_s3 + $0x18] sm:$0xff]  ;;  %v29_v16 = vld [vmem:[%s408_s2 + $0x8] sm:$0xff] }
   0xa   :  { %161 = vperm.xlu2 %255, %v155_v11   ;;  %v31_v17 = vld [vmem:[%s408_s2 + $0x18] sm:$0xff]  ;;  %v156_v18 = vld [vmem:[%s411_s5 + $0x8] sm:$0xff] }
   0xb   :  { %v158_v20 = vld [vmem:[%s411_s5 + $0x18] sm:$0xff] }
   0xc   :  { %134 = vperm.xlu0 %253, %v124_v12   ;;  %144 = vperm.xlu1 %254, %v126_v13  }
   0xf   :  { %240 = vmatmul.msk.f32.gmra.mxu0 %vm40_vm0, %v35_v14  ;;  %242 = vmatmul.msk.f32.gmra.mxu2 %vm40_vm0, %v37_v15 }
  0x10   :  { %244 = vmatmul.msk.f32.gmra.mxu1 %vm40_vm0, %v29_v16  ;;  %246 = vmatmul.msk.f32.gmra.mxu3 %vm40_vm0, %v31_v17 }
  0x12   :  { %166 = vperm.xlu2 %255, %v156_v18  }
  0x14   :  { %171 = vperm.xlu0 %253, %v157_v19   ;;  %176 = vperm.xlu1 %254, %v158_v20  }
  0x64   :  { %v162_v26 = vpop.permute.xlu2 %161 }
  0x6c   :  { %v167_v43 = vpop.permute.xlu2 %166 }
  0x76   :  { %v130_v21 = vpop.permute.xlu0 %129  ;;  %v140_v23 = vpop.permute.xlu1 %139 }
  0x7e   :  { %v135_v29 = vpop.permute.xlu0 %134  ;;  %v145_v37 = vpop.permute.xlu1 %144 }
  0x84   :  { %v70_v22 = vpop.f32.mrf.mxu0 }
  0x85   :  { %v111_v24 = vpop.f32.mrf.mxu1 }
  0x86   :  { %v112_v25 = vadd.f32 %v111_v24, %v70_v22  ;;  %v172_v47 = vpop.permute.xlu0 %171  ;;  %v177_v54 = vpop.permute.xlu1 %176 }
  0x88   :  { %v147_v27 = vadd.f32 %v130_v21, %v112_v25 }
  0x8a   :  { %v76_v28 = vpop.f32.mrf.mxu2  ;;  %v151_v34 = vmax.f32 %v147_v27, 0.0 }
  0x8b   :  { %v117_v30 = vpop.f32.mrf.mxu3 }
  0x8c   :  { %v118_v31 = vadd.f32 %v117_v30, %v76_v28  ;;  %v73_v32 = vpop.f32.mrf.mxu0  ;;  %v179_v39 = vmul.f32 %v162_v26, %v151_v34 }
  0x8d   :  { %v114_v33 = vpop.f32.mrf.mxu1 }
  0x8e   :  { %v149_v35 = vadd.f32 %v140_v23, %v118_v31  ;;  %v115_v36 = vadd.f32 %v114_v33, %v73_v32  ;;  %v184_v48 = vsel %vm183_vm1, %v179_v39, 0.0 }
  0x90   :  { %v148_v38 = vadd.f32 %v135_v29, %v115_v36  ;;  %v153_v40 = vmax.f32 %v149_v35, 0.0 }
  0x92   :  { %v152_v41 = vmax.f32 %v148_v38, 0.0  ;;  %v79_v42 = vpop.f32.mrf.mxu2  ;;  %v181_v49 = vmul.f32 %v172_v47, %v153_v40 }
  0x93   :  { %v120_v44 = vpop.f32.mrf.mxu3 }
  0x94   :  { %v180_v45 = vmul.f32 %v167_v43, %v152_v41  ;;  %v121_v46 = vadd.f32 %v120_v44, %v79_v42  ;;  %v187_v55 = vsel %vm183_vm1, %v181_v49, 0.0 }
  0x96   :  { %v185_v50 = vsel %vm183_vm1, %v180_v45, 0.0  ;;  %v150_v51 = vadd.f32 %v145_v37, %v121_v46 }
  0x97   :  { %v186_v52 = vadd.f32 %v185_v50, %v184_v48 }
  0x98   :  { %v154_v53 = vmax.f32 %v150_v51, 0.0 }
  0x99   :  { %v188_v57 = vadd.f32 %v187_v55, %v186_v52 }
  0x9a   :  { %v182_v56 = vmul.f32 %v177_v54, %v154_v53 }
  0x9c   :  { %v189_v58 = vsel %vm183_vm1, %v182_v56, 0.0 }
  0x9d   :  { %v190_v59 = vadd.f32 %v189_v58, %v188_v57 }
  0x9f   :  { %v191_v60 = vrot.slane %v190_v59, 4 }
  0xa1   :  { %v192_v61 = vadd.f32 %v191_v60, %v190_v59 }
  0xa3   :  { %v193_v62 = vrot.slane %v192_v61, 2 }
  0xa5   :  { %v194_v63 = vadd.f32 %v193_v62, %v192_v61 }
  0xa7   :  { %v195_v0 = vrot.slane %v194_v63, 1 }
  0xa9   :  { %v196_v2 = vadd.f32 %v195_v0, %v194_v63 }
  0xab   :  { %v199_v3 = vadd.f32 %v198_v1, %v196_v2 }
  0xad   :  { %v200_v4 = vsub.f32 0.0, %v199_v3 }
  0xaf   :  { %v201_v5 = vmul.f32 1.442695, %v200_v4 }
  0xb1   :  { %256 = vpow2.f32 %v201_v5 }
  0xb7   :  { %v257_v6 = vpop.eup %256 }
  0xb8   :  { %v203_v7 = vadd.f32 1.0, %v257_v6 }
  0xba   :  { %258 = vrcp.f32 %v203_v7  ;;  %v215_v11 = vand.u32 2147483648, %v203_v7  ;;  %v213_v13 = vand.u32 2147483647, %v203_v7  ;;  %vm209_vm3 = vweird.f32 %v203_v7 }
  0xbc   :  { %v216_v15 = vor.u32 1.1754944e-38, %v215_v11  ;;  %vm214_vm5 = vcmp.eq.f32.partialorder %v213_v13, 8.507059e+37 }
  0xc0   :  { %v259_v8 = vpop.eup %258 }
  0xc1   :  { %v205_v9 = vmul.f32 %v259_v8, %v203_v7  ;;  %vm210_vm2 = vweird.f32 %v259_v8 }
  0xc2   :  { %vm211_vm4 = vmor %vm209_vm3, %vm210_vm2 }
  0xc3   :  { %v206_v10 = vsub.f32 1.0, %v205_v9 }
  0xc5   :  { %v207_v12 = vmul.f32 %v259_v8, %v206_v10 }
  0xc7   :  { %v208_v14 = vadd.f32 %v259_v8, %v207_v12 }
  0xc9   :  { %v212_v16 = vsel %vm211_vm4, %v259_v8, %v208_v14 }
  0xca   :  { %v217_v17 = vsel %vm214_vm5, %v216_v15, %v212_v16 }
  0xcb   :  { %v219_v18 = vmul.f32 5.0, %v217_v17 }
  0xcd   :  { %v220_v19 = vadd.f32 0.5, %v219_v18 }
  0xcf   :  { %222 = vst.msk [vmem:[#allocation3] sm:$0x1] %vm221_vm6, %v220_v19 }
  0xd0   :  { %233 = dma.vmem_to_hbm [thread:$0]  %s229_s14, 16, %s231_s1, [#allocation4]  }
  0xd1   :  { %284 = dma.done.wait [#allocation4], 16  }
  0xd2   :  { %285 = vsyncadd [#allocation4], 4294967280 }
  0xd3   :  { %238 = vsyncpa [#allocation4], 1 }

</bundles_post_ra>
